<compile_context>
chip_gen: v5e
topology: v5e:2x2
jax: 0.10.0
libtpu: 0.0.40
codegen_flags: <defaults>
</compile_context>

<pallas_src>
import jax
import jax.numpy as jnp
from jax.experimental import pallas as pl
from jax.experimental.pallas import tpu as pltpu

# Rows per grid step.  1024 rows x D(<=512) f32 = <=2 MiB per input buffer;
# 2 inputs x 2 pipeline buffers stays well inside the scoped-VMEM defaults on
# v5e (16 MiB), v6e (32 MiB) and v7x (32 MiB scoped / 64 MiB physical).
_MAX_TILE_ROWS = 1024


def _round_up(x, m):
    return ((x + m - 1) // m) * m


def _discriminator_kernel(bc_ref, v_ref, hpl_ref, hmi_ref, out_ref):
    """One (TN, D) row-tile of positive + corrupted embeddings.

    bc_ref : (1,)    SMEM scalar, bc = dot(bias, c)
    v_ref  : (1, D)  VMEM,        v  = c @ W  (Linear weight folded into c)
    hpl_ref: (TN, D) VMEM         positive embedding tile
    hmi_ref: (TN, D) VMEM         corrupted embedding tile
    out_ref: (2, TN) VMEM         row 0 = sc_1 tile, row 1 = sc_2 tile
    """
    v = v_ref[...].astype(jnp.float32)            # (1, D), broadcasts over rows
    bc = bc_ref[0]                                # scalar (f32 in SMEM)

    h_pl = hpl_ref[...].astype(jnp.float32)       # (TN, D)
    h_mi = hmi_ref[...].astype(jnp.float32)       # (TN, D)

    # sc = h @ v + bc, computed as VPU multiply + XLU lane reduce (f32 accum).
    sc_1 = jnp.sum(h_pl * v, axis=-1) + bc        # (TN,)
    sc_2 = jnp.sum(h_mi * v, axis=-1) + bc        # (TN,)

    out_ref[0, :] = sc_1.astype(out_ref.dtype)
    out_ref[1, :] = sc_2.astype(out_ref.dtype)


def discriminator_forward(c, h_pl, h_mi, weight, bias):
    """JAX wrapper matching Discriminator.forward.

    c      : (D,)    summary vector
    h_pl   : (N, D)  positive embeddings
    h_mi   : (N, D)  negative embeddings
    weight : (D, D)  nn.Linear weight, (out_features, in_features)
    bias   : (D,)    nn.Linear bias
    returns: (2N,)   logits = cat([sc_1, sc_2], -1), float32
    """
    n, d = h_pl.shape
    assert h_mi.shape == (n, d)
    assert weight.shape == (d, d)
    assert bias.shape == (d,)
    assert c.shape == (d,)

    # Algebraic fold: (h @ W^T + b) . c  ==  h @ (c @ W) + (b . c).
    # These are tiny O(D^2) / O(D) XLA ops; the kernel only streams h_pl/h_mi.
    c_f32 = c.astype(jnp.float32)
    v = jnp.dot(c_f32, weight.astype(jnp.float32)).reshape(1, d)     # (1, D)
    bc = jnp.dot(bias.astype(jnp.float32), c_f32).reshape(1)         # (1,)

    # Lane-dense row tiles; pad N so every (2, TN) output block is full.
    tn = min(_MAX_TILE_ROWS, _round_up(n, 128))
    n_pad = _round_up(n, tn)
    if n_pad != n:
        pad = ((0, n_pad - n), (0, 0))
        h_pl = jnp.pad(h_pl, pad)
        h_mi = jnp.pad(h_mi, pad)

    grid = (n_pad // tn,)

    out = pl.pallas_call(
        _discriminator_kernel,
        out_shape=jax.ShapeDtypeStruct((2, n_pad), jnp.float32),
        grid=grid,
        in_specs=[
            pl.BlockSpec(memory_space=pltpu.MemorySpace.SMEM),   # bc scalar
            pl.BlockSpec((1, d), lambda i: (0, 0)),              # v (resident)
            pl.BlockSpec((tn, d), lambda i: (i, 0)),             # h_pl tile
            pl.BlockSpec((tn, d), lambda i: (i, 0)),             # h_mi tile
        ],
        out_specs=pl.BlockSpec((2, tn), lambda i: (0, i)),
        compiler_params=pltpu.CompilerParams(
            dimension_semantics=("parallel",)),
    )(bc, v, h_pl, h_mi)

    # Row 0 = sc_1, row 1 = sc_2 -> flatten matches torch.cat((sc_1, sc_2), -1).
    return out[:, :n].reshape(2 * n)


def _reference_forward(c, h_pl, h_mi, weight, bias):
    """Pure-JAX reference mirroring the PyTorch module."""
    proj_pl = h_pl @ weight.T + bias
    proj_mi = h_mi @ weight.T + bias
    sc_1 = jnp.sum(proj_pl * c[None, :], axis=-1)
    sc_2 = jnp.sum(proj_mi * c[None, :], axis=-1)
    return jnp.concatenate([sc_1, sc_2], axis=-1)


if __name__ == "__main__":
    # Small shapes: cl_hdim = 32 hidden dim, N = 8 nodes.
    D = 32   # config['cl_hdim']
    N = 8    # number of nodes

    key = jax.random.PRNGKey(0)
    k_c, k_pl, k_mi, k_w, k_b = jax.random.split(key, 5)

    c = jax.random.normal(k_c, (D,), dtype=jnp.float32)
    h_pl = jax.random.normal(k_pl, (N, D), dtype=jnp.float32)
    h_mi = jax.random.normal(k_mi, (N, D), dtype=jnp.float32)

    # Deterministic nn.Linear init: U(-1/sqrt(D), 1/sqrt(D)) for weight & bias.
    bound = 1.0 / jnp.sqrt(jnp.float32(D))
    weight = jax.random.uniform(k_w, (D, D), dtype=jnp.float32,
                                minval=-bound, maxval=bound)
    bias = jax.random.uniform(k_b, (D,), dtype=jnp.float32,
                              minval=-bound, maxval=bound)

    logits = discriminator_forward(c, h_pl, h_mi, weight, bias)
    logits = jax.block_until_ready(logits)

    ref = _reference_forward(c, h_pl, h_mi, weight, bias)
    assert logits.shape == (2 * N,)
    assert jnp.allclose(logits, ref, atol=1e-4, rtol=1e-4), (
        f"mismatch: {logits} vs {ref}")

    print("KERNEL_OK")
</pallas_src>

<mosaic_0001>
module attributes {stable_mosaic.version = 11 : i64} {
  func.func @_discriminator_kernel(%arg0: i32, %arg1: memref<1xf32, #tpu.memory_space<smem>>, %arg2: memref<1x32xf32, #tpu.memory_space<vmem>>, %arg3: memref<128x32xf32, #tpu.memory_space<vmem>>, %arg4: memref<128x32xf32, #tpu.memory_space<vmem>>, %arg5: memref<2x128xf32, #tpu.memory_space<vmem>>) attributes {dimension_semantics = [#tpu.dimension_semantics<parallel>], iteration_bounds = array<i64: 1>, scalar_prefetch = 0 : i64, scratch_operands = 0 : i64, tpu.core_type = #tpu.core_type<tc>, window_params = [{transform_indices = @transform_0, window_bounds = array<i64: 1>}, {pipeline_mode = #tpu.pipeline_mode<synchronous>, transform_indices = @transform_1, window_bounds = array<i64: 1, 32>}, {transform_indices = @transform_2, window_bounds = array<i64: 128, 32>}, {transform_indices = @transform_3, window_bounds = array<i64: 128, 32>}, {transform_indices = @transform_4, window_bounds = array<i64: 2, 128>}]} {
    %c0 = arith.constant 0 : index
    %c0_0 = arith.constant 0 : index
    %0 = vector.load %arg2[%c0, %c0_0] : memref<1x32xf32, #tpu.memory_space<vmem>>, vector<1x32xf32>
    %c0_1 = arith.constant 0 : index
    %1 = memref.load %arg1[%c0_1] : memref<1xf32, #tpu.memory_space<smem>>
    %c0_2 = arith.constant 0 : index
    %c0_3 = arith.constant 0 : index
    %2 = vector.load %arg3[%c0_2, %c0_3] : memref<128x32xf32, #tpu.memory_space<vmem>>, vector<128x32xf32>
    %c0_4 = arith.constant 0 : index
    %c0_5 = arith.constant 0 : index
    %3 = vector.load %arg4[%c0_4, %c0_5] : memref<128x32xf32, #tpu.memory_space<vmem>>, vector<128x32xf32>
    %4 = vector.broadcast %0 : vector<1x32xf32> to vector<128x32xf32>
    %5 = arith.mulf %2, %4 : vector<128x32xf32>
    %cst = arith.constant dense<0.000000e+00> : vector<128xf32>
    %6 = vector.multi_reduction <add>, %5, %cst [1] : vector<128x32xf32> to vector<128xf32>
    %7 = vector.broadcast %1 : f32 to vector<128xf32>
    %8 = arith.addf %6, %7 : vector<128xf32>
    %9 = vector.broadcast %0 : vector<1x32xf32> to vector<128x32xf32>
    %10 = arith.mulf %3, %9 : vector<128x32xf32>
    %cst_6 = arith.constant dense<0.000000e+00> : vector<128xf32>
    %11 = vector.multi_reduction <add>, %10, %cst_6 [1] : vector<128x32xf32> to vector<128xf32>
    %12 = vector.broadcast %1 : f32 to vector<128xf32>
    %13 = arith.addf %11, %12 : vector<128xf32>
    %c0_7 = arith.constant 0 : index
    %c0_8 = arith.constant 0 : index
    %14 = vector.load %arg5[%c0_7, %c0_8] : memref<2x128xf32, #tpu.memory_space<vmem>>, vector<1x128xf32>
    %15 = vector.shape_cast %14 : vector<1x128xf32> to vector<128xf32>
    %16 = vector.shape_cast %8 : vector<128xf32> to vector<1x128xf32>
    tpu.vector_store %arg5[%c0_7, %c0_8], %16 {strides = array<i32>} : memref<2x128xf32, #tpu.memory_space<vmem>>, vector<1x128xf32>,
    %c1 = arith.constant 1 : index
    %c0_9 = arith.constant 0 : index
    %17 = vector.load %arg5[%c1, %c0_9] : memref<2x128xf32, #tpu.memory_space<vmem>>, vector<1x128xf32>
    %18 = vector.shape_cast %17 : vector<1x128xf32> to vector<128xf32>
    %19 = vector.shape_cast %13 : vector<128xf32> to vector<1x128xf32>
    tpu.vector_store %arg5[%c1, %c0_9], %19 {strides = array<i32>} : memref<2x128xf32, #tpu.memory_space<vmem>>, vector<1x128xf32>,
    return
  }
  func.func @transform_0(%arg0: i32) -> i32 {
    %c0_i32 = arith.constant 0 : i32
    %c0_i32_0 = arith.constant 0 : i32
    return %c0_i32 : i32
  }
  func.func @transform_1(%arg0: i32) -> (i32, i32) {
    %c0_i32 = arith.constant 0 : i32
    %c0_i32_0 = arith.constant 0 : i32
    %c0_i32_1 = arith.constant 0 : i32
    return %c0_i32, %c0_i32_0 : i32, i32
  }
  func.func @transform_2(%arg0: i32) -> (i32, i32) {
    %c0_i32 = arith.constant 0 : i32
    %c0_i32_0 = arith.constant 0 : i32
    return %arg0, %c0_i32 : i32, i32
  }
  func.func @transform_3(%arg0: i32) -> (i32, i32) {
    %c0_i32 = arith.constant 0 : i32
    %c0_i32_0 = arith.constant 0 : i32
    return %arg0, %c0_i32 : i32, i32
  }
  func.func @transform_4(%arg0: i32) -> (i32, i32) {
    %c0_i32 = arith.constant 0 : i32
    %c0_i32_0 = arith.constant 0 : i32
    return %c0_i32, %arg0 : i32, i32
  }
}

</mosaic_0001>

<bundles_post_ra>
// kernel: tpu_custom_call.1
= control target key start
LH: loop header
LB: loop body
LE: loop exit
PB: predicated region body
PF: predicated region fallthrough
CT: control target
= control target key end

     0   :  { %vm72_vm0 = vcmask 261120   ;;  %s671_s0 = inlined_call_operand.<no memory space> [shape: f32[1], index: 0, kind: input, shape index: {}]   ;;  %s672_s1 = inlined_call_operand.vmem [shape: f32[1,32], index: 1, kind: input, shape index: {}]   ;;  %s673_s2 = inlined_call_operand.vmem [shape: f32[128,32], index: 2, kind: input, shape index: {}]   ;;  %s674_s3 = inlined_call_operand.vmem [shape: f32[128,32], index: 3, kind: input, shape index: {}]   ;;  %s675_s4 = inlined_call_operand.hbm [shape: f32[2,128], index: 4, kind: output, shape index: {}]  }
   0x1   :  { %v23_v0 = vld [vmem:[%s673_s2 + $0x10] sm:$0xff]  ;;  %v424_v1 = vld [vmem:[%s672_s1] ss:$0 sm:$0xff]  ;;  %v24_v7 = vld [vmem:[%s673_s2 + $0x18] sm:$0xff] }
   0x2   :  { %v21_v2 = vld [vmem:[%s673_s2] sm:$0xff]  ;;  %v58_v4 = vmul.f32 %v424_v1, %v23_v0  ;;  %v22_v8 = vld [vmem:[%s673_s2 + $0x8] sm:$0xff]  ;;  %v59_v13 = vmul.f32 %v424_v1, %v24_v7 }
   0x3   :  { %v25_v3 = vld [vmem:[%s673_s2 + $0x20] sm:$0xff]  ;;  %v56_v5 = vmul.f32 %v424_v1, %v21_v2  ;;  %v26_v12 = vld [vmem:[%s673_s2 + $0x28] sm:$0xff]  ;;  %v57_v14 = vmul.f32 %v424_v1, %v22_v8 }
   0x4   :  { %v60_v6 = vmul.f32 %v424_v1, %v25_v3  ;;  %v79_v9 = vsel %vm72_vm0, %v58_v4, 0.0 }
   0x5   :  { %v73_v10 = vsel %vm72_vm0, %v56_v5, 0.0  ;;  %80 = vadd.xlane.f32.xlu1 %v79_v9 }
   0x6   :  { %v85_v11 = vsel %vm72_vm0, %v60_v6, 0.0  ;;  %74 = vadd.xlane.f32.xlu0 %v73_v10 }
   0x7   :  { %86 = vadd.xlane.f32.xlu2 %v85_v11 }
   0x8   :  { %10 = vsyncpa [#allocation4], 0  ;;  %v61_v15 = vmul.f32 %v424_v1, %v26_v12  ;;  %v82_v16 = vsel %vm72_vm0, %v59_v13, 0.0  ;;  %v76_v17 = vsel %vm72_vm0, %v57_v14, 0.0  ;;  %v28_v19 = vld [vmem:[%s673_s2 + $0x38] sm:$0xff]  ;;  %v27_v20 = vld [vmem:[%s673_s2 + $0x30] sm:$0xff] }
   0x9   :  { %v29_v21 = vld [vmem:[%s673_s2 + $0x40] sm:$0xff]  ;;  %v63_v22 = vmul.f32 %v424_v1, %v28_v19  ;;  %v62_v23 = vmul.f32 %v424_v1, %v27_v20  ;;  %v31_v28 = vld [vmem:[%s673_s2 + $0x50] sm:$0xff]  ;;  %v30_v29 = vld [vmem:[%s673_s2 + $0x48] sm:$0xff]  ;;  %vm239_vm1 = vcmask 130112   ;;  %vm243_vm2 = vcmask 195712   ;;  %s355_s29 = sshll.u32 %s675_s4, 4  ;;  %s356_s29 = int_to_ptr.hbm [resolvable:$true] %s355_s29 }
   0xa   :  { %v88_v18 = vsel %vm72_vm0, %v61_v15, 0.0  ;;  %v64_v24 = vmul.f32 %v424_v1, %v29_v21  ;;  %v32_v30 = vld [vmem:[%s673_s2 + $0x58] sm:$0xff]  ;;  %v66_v31 = vmul.f32 %v424_v1, %v31_v28  ;;  %v65_v32 = vmul.f32 %v424_v1, %v30_v29  ;;  %v38_v37 = vld [vmem:[%s674_s3 + $0x8] sm:$0xff]  ;;  %v37_v38 = vld [vmem:[%s674_s3] sm:$0xff] }
   0xb   :  { %v94_v25 = vsel %vm72_vm0, %v63_v22, 0.0  ;;  %v91_v26 = vsel %vm72_vm0, %v62_v23, 0.0  ;;  %v67_v33 = vmul.f32 %v424_v1, %v32_v30  ;;  %v39_v39 = vld [vmem:[%s674_s3 + $0x10] sm:$0xff]  ;;  %v139_v40 = vmul.f32 %v424_v1, %v38_v37  ;;  %v49_v42 = vld [vmem:[%s674_s3 + $0x60] sm:$0xff]  ;;  %v34_v50 = vld [vmem:[%s673_s2 + $0x68] sm:$0xff] }
   0xc   :  { %v97_v27 = vsel %vm72_vm0, %v64_v24, 0.0  ;;  %v103_v34 = vsel %vm72_vm0, %v66_v31, 0.0  ;;  %v100_v35 = vsel %vm72_vm0, %v65_v32, 0.0  ;;  %v138_v41 = vmul.f32 %v424_v1, %v37_v38  ;;  %v33_v46 = vld [vmem:[%s673_s2 + $0x60] sm:$0xff]  ;;  %v40_v53 = vld [vmem:[%s674_s3 + $0x18] sm:$0xff]  ;;  %v42_v55 = vld [vmem:[%s674_s3 + $0x28] sm:$0xff] }
   0xd   :  { %83 = vadd.xlane.f32.xlu1 %v82_v16  ;;  %v106_v36 = vsel %vm72_vm0, %v67_v33, 0.0  ;;  %v140_v43 = vmul.f32 %v424_v1, %v39_v39  ;;  %v150_v44 = vmul.f32 %v424_v1, %v49_v42  ;;  %v157_v47 = vsel %vm72_vm0, %v139_v40, 0.0  ;;  %v41_v52 = vld [vmem:[%s674_s3 + $0x20] sm:$0xff]  ;;  %v35_v60 = vld [vmem:[%s673_s2 + $0x70] sm:$0xff]  ;;  %v50_v0 = vld [vmem:[%s674_s3 + $0x68] sm:$0xff] }
   0xe   :  { %77 = vadd.xlane.f32.xlu0 %v76_v17  ;;  %v154_v48 = vsel %vm72_vm0, %v138_v41, 0.0  ;;  %v68_v49 = vmul.f32 %v424_v1, %v33_v46  ;;  %v69_v54 = vmul.f32 %v424_v1, %v34_v50  ;;  %v142_v58 = vmul.f32 %v424_v1, %v41_v52  ;;  %v51_v5 = vld [vmem:[%s674_s3 + $0x70] sm:$0xff]  ;;  %v44_v7 = vld [vmem:[%s674_s3 + $0x38] sm:$0xff]  ;;  %v45_v10 = vld [vmem:[%s674_s3 + $0x40] sm:$0xff] }
   0xf   :  { %89 = vadd.xlane.f32.xlu2 %v88_v18  ;;  %v500_v45 = vsel %vm72_vm0, %v150_v44, 0.0  ;;  %v160_v51 = vsel %vm72_vm0, %v140_v43, 0.0  ;;  %v141_v59 = vmul.f32 %v424_v1, %v40_v53  ;;  %v143_v61 = vmul.f32 %v424_v1, %v42_v55  ;;  %v43_v8 = vld [vmem:[%s674_s3 + $0x30] sm:$0xff]  ;;  %v52_v15 = vld [vmem:[%s674_s3 + $0x78] sm:$0xff] }
  0x10   :  { %v109_v56 = vsel %vm72_vm0, %v68_v49, 0.0  ;;  %v112_v57 = vsel %vm72_vm0, %v69_v54, 0.0  ;;  %v70_v62 = vmul.f32 %v424_v1, %v35_v60  ;;  %v166_v2 = vsel %vm72_vm0, %v142_v58, 0.0  ;;  %v36_v19 = vld [vmem:[%s673_s2 + $0x78] sm:$0xff]  ;;  %v47_v24 = vld [vmem:[%s674_s3 + $0x50] sm:$0xff] }
  0x11   :  { %v163_v3 = vsel %vm72_vm0, %v141_v59, 0.0  ;;  %v151_v4 = vmul.f32 %v424_v1, %v50_v0  ;;  %v169_v6 = vsel %vm72_vm0, %v143_v61, 0.0  ;;  %v152_v9 = vmul.f32 %v424_v1, %v51_v5 }
  0x12   :  { %v115_v63 = vsel %vm72_vm0, %v70_v62, 0.0  ;;  %v145_v13 = vmul.f32 %v424_v1, %v44_v7  ;;  %v144_v14 = vmul.f32 %v424_v1, %v43_v8  ;;  %v146_v16 = vmul.f32 %v424_v1, %v45_v10 }
  0x13   :  { %v193_v11 = vsel %vm72_vm0, %v151_v4, 0.0  ;;  %v196_v12 = vsel %vm72_vm0, %v152_v9, 0.0  ;;  %v153_v17 = vmul.f32 %v424_v1, %v52_v15  ;;  %v71_v22 = vmul.f32 %v424_v1, %v36_v19 }
  0x14   :  { %v175_v20 = vsel %vm72_vm0, %v145_v13, 0.0  ;;  %v172_v21 = vsel %vm72_vm0, %v144_v14, 0.0  ;;  %v178_v23 = vsel %vm72_vm0, %v146_v16, 0.0  ;;  %v148_v28 = vmul.f32 %v424_v1, %v47_v24 }
  0x15   :  { %95 = vadd.xlane.f32.xlu1 %v94_v25  ;;  %v199_v18 = vsel %vm72_vm0, %v153_v17, 0.0  ;;  %v46_v25 = vld [vmem:[%s674_s3 + $0x48] sm:$0xff]  ;;  %v589_v37 = vstv %s671_s0  ;;  %vm247_vm3 = vcmask 261312   ;;  %vm251_vm4 = vcmask 326912   ;;  %s392_s0 = smov [#allocation3]  }
  0x16   :  { %92 = vadd.xlane.f32.xlu0 %v91_v26  ;;  %v48_v26 = vld [vmem:[%s674_s3 + $0x58] sm:$0xff]  ;;  %v147_v29 = vmul.f32 %v424_v1, %v46_v25  ;;  %v184_v31 = vsel %vm72_vm0, %v148_v28, 0.0  ;;  %vm255_vm5 = vcmask 392512   ;;  %vm259_vm6 = vcmask 458112   ;;  %s353_s26 = sshll.u32 %s392_s0, 4  ;;  %s354_s26 = int_to_ptr.vmem [resolvable:$true] %s353_s26 }
  0x17   :  { %98 = vadd.xlane.f32.xlu2 %v97_v27  ;;  %v118_v27 = vsel %vm72_vm0, %v71_v22, 0.0  ;;  %v149_v30 = vmul.f32 %v424_v1, %v48_v26  ;;  %vm263_vm7 = vcmask 523712   ;;  %vm267_vm8 = vcmask 589312  }
  0x18   :  { %v181_v32 = vsel %vm72_vm0, %v147_v29, 0.0  ;;  %vm271_vm9 = vcmask 654912   ;;  %vm275_vm10 = vcmask 720512   ;;  %vm279_vm11 = vcmask 786112  }
  0x19   :  { %v187_v33 = vsel %vm72_vm0, %v149_v30, 0.0  ;;  %vm283_vm12 = vcmask 851712   ;;  %vm287_vm13 = vcmask 917312   ;;  %vm291_vm14 = vcmask 982912  }
  0x1a   :  { %vm295_vm15 = vcmask 1048512  }
  0x1d   :  { %104 = vadd.xlane.f32.xlu1 %v103_v34  ;;  %v234_v34 = vlaneseq }
  0x1e   :  { %101 = vadd.xlane.f32.xlu0 %v100_v35 }
  0x1f   :  { %107 = vadd.xlane.f32.xlu2 %v106_v36  ;;  %v591_v38 = vand.u32 127, %v234_v34 }
  0x21   :  { %v237_v40 = vadd.s32 4294967288, %v591_v38  ;;  %v241_v41 = vadd.s32 4294967280, %v591_v38  ;;  %v245_v10 = vadd.s32 4294967272, %v591_v38  ;;  %v253_v19 = vadd.s32 4294967256, %v591_v38 }
  0x22   :  { %v261_v34 = vadd.s32 4294967240, %v591_v38 }
  0x25   :  { %158 = vadd.xlane.f32.xlu1 %v157_v47 }
  0x26   :  { %155 = vadd.xlane.f32.xlu0 %v154_v48 }
  0x27   :  { %161 = vadd.xlane.f32.xlu2 %v160_v51 }
  0x2d   :  { %167 = vadd.xlane.f32.xlu1 %v166_v2 }
  0x2e   :  { %164 = vadd.xlane.f32.xlu0 %v163_v3 }
  0x2f   :  { %170 = vadd.xlane.f32.xlu2 %v169_v6 }
  0x35   :  { %176 = vadd.xlane.f32.xlu1 %v175_v20 }
  0x36   :  { %173 = vadd.xlane.f32.xlu0 %v172_v21  ;;  %v257_v21 = vadd.s32 4294967248, %v591_v38 }
  0x37   :  { %179 = vadd.xlane.f32.xlu2 %v178_v23 }
  0x3d   :  { %185 = vadd.xlane.f32.xlu1 %v184_v31 }
  0x3e   :  { %182 = vadd.xlane.f32.xlu0 %v181_v32 }
  0x3f   :  { %188 = vadd.xlane.f32.xlu2 %v187_v33 }
  0x45   :  { %191 = vadd.xlane.f32.xlu1 %v500_v45 }
  0x46   :  { %110 = vadd.xlane.f32.xlu0 %v109_v56 }
  0x47   :  { %113 = vadd.xlane.f32.xlu2 %v112_v57 }
  0x4d   :  { %116 = vadd.xlane.f32.xlu1 %v115_v63 }
  0x4e   :  { %194 = vadd.xlane.f32.xlu0 %v193_v11 }
  0x4f   :  { %197 = vadd.xlane.f32.xlu2 %v196_v12  ;;  %v249_v12 = vadd.s32 4294967264, %v591_v38 }
  0x55   :  { %200 = vadd.xlane.f32.xlu1 %v199_v18 }
  0x56   :  { %119 = vadd.xlane.f32.xlu0 %v118_v27 }
  0x78   :  { %v81_v1 = vpop.xlane.xlu1 %80 }
  0x79   :  { %v75_v35 = vpop.xlane.xlu0 %74  ;;  %v124_v42 = vadd.f32 %v589_v37, %v81_v1 }
  0x7a   :  { %v87_v36 = vpop.xlane.xlu2 %86  ;;  %v122_v39 = vadd.f32 %v589_v37, %v75_v35 }
  0x7b   :  { %v242_v49 = vperm.slane %v124_v42, %v241_v41  ;;  %v126_v15 = vadd.f32 %v589_v37, %v87_v36 }
  0x7c   :  { %v236_v47 = vperm.slane %v122_v39, %v591_v38 }
  0x7d   :  { %v250_v31 = vperm.slane %v126_v15, %v249_v12 }
  0x80   :  { %v84_v43 = vpop.xlane.xlu1 %83 }
  0x81   :  { %v78_v44 = vpop.xlane.xlu0 %77  ;;  %v125_v11 = vadd.f32 %v589_v37, %v84_v43  ;;  %v265_v43 = vadd.s32 4294967232, %v591_v38 }
  0x82   :  { %v123_v45 = vadd.f32 %v589_v37, %v78_v44  ;;  %v90_v46 = vpop.xlane.xlu2 %89 }
  0x83   :  { %v246_v18 = vperm.slane %v125_v11, %v245_v10  ;;  %v127_v20 = vadd.f32 %v589_v37, %v90_v46 }
  0x84   :  { %v238_v48 = vperm.slane %v123_v45, %v237_v40  ;;  %v269_v45 = vadd.s32 4294967224, %v591_v38 }
  0x85   :  { %v254_v33 = vperm.slane %v127_v20, %v253_v19 }
  0x86   :  { %v240_v50 = vsel %vm239_vm1, %v238_v48, %v236_v47 }
  0x87   :  { %v244_v51 = vsel %vm243_vm2, %v242_v49, %v240_v50 }
  0x88   :  { %v96_v52 = vpop.xlane.xlu1 %95  ;;  %v248_v26 = vsel %vm247_vm3, %v246_v18, %v244_v51 }
  0x89   :  { %v93_v53 = vpop.xlane.xlu0 %92  ;;  %v129_v1 = vadd.f32 %v589_v37, %v96_v52  ;;  %v252_v35 = vsel %vm251_vm4, %v250_v31, %v248_v26  ;;  %v289_v26 = vadd.s32 4294967184, %v591_v38 }
  0x8a   :  { %v99_v54 = vpop.xlane.xlu2 %98  ;;  %v128_v22 = vadd.f32 %v589_v37, %v93_v53  ;;  %v256_v46 = vsel %vm255_vm5, %v254_v33, %v252_v35 }
  0x8b   :  { %v130_v44 = vadd.f32 %v589_v37, %v99_v54  ;;  %v262_v47 = vperm.slane %v129_v1, %v261_v34  ;;  %v293_v1 = vadd.s32 4294967176, %v591_v38 }
  0x8c   :  { %v258_v36 = vperm.slane %v128_v22, %v257_v21  ;;  %v285_v22 = vadd.s32 4294967192, %v591_v38 }
  0x8e   :  { %v260_v50 = vsel %vm259_vm6, %v258_v36, %v256_v46 }
  0x90   :  { %v601_v55 = vpop.xlane.xlu1 %104 }
  0x91   :  { %v102_v56 = vpop.xlane.xlu0 %101 }
  0x92   :  { %v603_v57 = vpop.xlane.xlu2 %107  ;;  %v131_v48 = vadd.f32 %v589_v37, %v102_v56  ;;  %v132_v56 = vadd.f32 %v589_v37, %v601_v55 }
  0x98   :  { %v159_v58 = vpop.xlane.xlu1 %158 }
  0x99   :  { %v156_v59 = vpop.xlane.xlu0 %155  ;;  %v203_v0 = vadd.f32 %v159_v58, %v589_v37 }
  0x9a   :  { %v162_v60 = vpop.xlane.xlu2 %161  ;;  %v202_v2 = vadd.f32 %v156_v59, %v589_v37 }
  0x9b   :  { %v204_v5 = vadd.f32 %v162_v60, %v589_v37  ;;  %v316_v7 = vperm.slane %v203_v0, %v237_v40  ;;  %v270_v0 = vperm.slane %v131_v48, %v269_v45 }
  0x9c   :  { %v315_v8 = vperm.slane %v202_v2, %v591_v38 }
  0x9d   :  { %v318_v13 = vperm.slane %v204_v5, %v241_v41 }
  0x9e   :  { %v317_v16 = vsel %vm239_vm1, %v316_v7, %v315_v8 }
  0x9f   :  { %v319_v27 = vsel %vm243_vm2, %v318_v13, %v317_v16 }
  0xa0   :  { %v168_v61 = vpop.xlane.xlu1 %167 }
  0xa1   :  { %v165_v62 = vpop.xlane.xlu0 %164  ;;  %v206_v14 = vadd.f32 %v168_v61, %v589_v37  ;;  %v266_v61 = vperm.slane %v130_v44, %v265_v43 }
  0xa2   :  { %v171_v63 = vpop.xlane.xlu2 %170  ;;  %v205_v9 = vadd.f32 %v165_v62, %v589_v37  ;;  %v273_v62 = vadd.s32 4294967216, %v591_v38 }
  0xa3   :  { %v207_v23 = vadd.f32 %v171_v63, %v589_v37  ;;  %v322_v28 = vperm.slane %v206_v14, %v249_v12  ;;  %v264_v63 = vsel %vm263_vm7, %v262_v47, %v260_v50  ;;  %v281_v14 = vadd.s32 4294967200, %v591_v38 }
  0xa4   :  { %v320_v17 = vperm.slane %v205_v9, %v245_v10  ;;  %v268_v7 = vsel %vm267_vm8, %v266_v61, %v264_v63  ;;  %v274_v8 = vperm.slane %v132_v56, %v273_v62  ;;  %v133_v9 = vadd.f32 %v589_v37, %v603_v57 }
  0xa5   :  { %v324_v39 = vperm.slane %v207_v23, %v253_v19  ;;  %v272_v55 = vsel %vm271_vm9, %v270_v0, %v268_v7 }
  0xa6   :  { %v321_v32 = vsel %vm247_vm3, %v320_v17, %v319_v27  ;;  %v276_v57 = vsel %vm275_vm10, %v274_v8, %v272_v55 }
  0xa7   :  { %v323_v41 = vsel %vm251_vm4, %v322_v28, %v321_v32 }
  0xa8   :  { %v177_v3 = vpop.xlane.xlu1 %176  ;;  %v325_v51 = vsel %vm255_vm5, %v324_v39, %v323_v41 }
  0xa9   :  { %v174_v4 = vpop.xlane.xlu0 %173  ;;  %v209_v40 = vadd.f32 %v177_v3, %v589_v37 }
  0xaa   :  { %v180_v6 = vpop.xlane.xlu2 %179  ;;  %v208_v29 = vadd.f32 %v174_v4, %v589_v37 }
  0xab   :  { %v210_v49 = vadd.f32 %v180_v6, %v589_v37  ;;  %v328_v52 = vperm.slane %v209_v40, %v261_v34  ;;  %v277_v6 = vadd.s32 4294967208, %v591_v38 }
  0xac   :  { %v326_v42 = vperm.slane %v208_v29, %v257_v21 }
  0xad   :  { %v330_v2 = vperm.slane %v210_v49, %v265_v43  ;;  %v278_v21 = vperm.slane %v133_v9, %v277_v6 }
  0xae   :  { %v327_v54 = vsel %vm259_vm6, %v326_v42, %v325_v51 }
  0xaf   :  { %v329_v4 = vsel %vm263_vm7, %v328_v52, %v327_v54  ;;  %v280_v32 = vsel %vm279_vm11, %v278_v21, %v276_v57 }
  0xb0   :  { %v186_v24 = vpop.xlane.xlu1 %185  ;;  %v331_v10 = vsel %vm267_vm8, %v330_v2, %v329_v4 }
  0xb1   :  { %v183_v25 = vpop.xlane.xlu0 %182  ;;  %v212_v3 = vadd.f32 %v186_v24, %v589_v37 }
  0xb2   :  { %v189_v30 = vpop.xlane.xlu2 %188  ;;  %v211_v53 = vadd.f32 %v183_v25, %v589_v37 }
  0xb3   :  { %v334_v11 = vperm.slane %v212_v3, %v273_v62  ;;  %v213_v12 = vadd.f32 %v189_v30, %v589_v37 }
  0xb4   :  { %v332_v5 = vperm.slane %v211_v53, %v269_v45 }
  0xb5   :  { %v336_v24 = vperm.slane %v213_v12, %v277_v6 }
  0xb6   :  { %v333_v13 = vsel %vm271_vm9, %v332_v5, %v331_v10 }
  0xb7   :  { %v335_v23 = vsel %vm275_vm10, %v334_v11, %v333_v13 }
  0xb8   :  { %v192_v58 = vpop.xlane.xlu1 %191  ;;  %v337_v33 = vsel %vm279_vm11, %v336_v24, %v335_v23 }
  0xb9   :  { %v111_v59 = vpop.xlane.xlu0 %110  ;;  %v214_v15 = vadd.f32 %v192_v58, %v589_v37 }
  0xba   :  { %v114_v60 = vpop.xlane.xlu2 %113  ;;  %v134_v16 = vadd.f32 %v589_v37, %v111_v59 }
  0xbb   :  { %v135_v25 = vadd.f32 %v589_v37, %v114_v60  ;;  %v338_v27 = vperm.slane %v214_v15, %v281_v14 }
  0xbc   :  { %v282_v28 = vperm.slane %v134_v16, %v281_v14 }
  0xbd   :  { %v286_v34 = vperm.slane %v135_v25, %v285_v22  ;;  %v339_v35 = vsel %vm283_vm12, %v338_v27, %v337_v33 }
  0xbe   :  { %v284_v36 = vsel %vm283_vm12, %v282_v28, %v280_v32 }
  0xbf   :  { %v288_v38 = vsel %vm287_vm13, %v286_v34, %v284_v36 }
  0xc0   :  { %v117_v17 = vpop.xlane.xlu1 %116 }
  0xc1   :  { %v195_v18 = vpop.xlane.xlu0 %194  ;;  %v136_v29 = vadd.f32 %v589_v37, %v117_v17 }
  0xc2   :  { %v215_v19 = vadd.f32 %v195_v18, %v589_v37  ;;  %v198_v20 = vpop.xlane.xlu2 %197 }
  0xc3   :  { %v216_v30 = vadd.f32 %v198_v20, %v589_v37  ;;  %v290_v39 = vperm.slane %v136_v29, %v289_v26 }
  0xc4   :  { %v340_v31 = vperm.slane %v215_v19, %v285_v22 }
  0xc5   :  { %v342_v40 = vperm.slane %v216_v30, %v289_v26  ;;  %v292_v48 = vsel %vm291_vm14, %v290_v39, %v288_v38 }
  0xc6   :  { %v341_v43 = vsel %vm287_vm13, %v340_v31, %v339_v35 }
  0xc7   :  { %v343_v49 = vsel %vm291_vm14, %v342_v40, %v341_v43 }
  0xc8   :  { %v201_v41 = vpop.xlane.xlu1 %200 }
  0xc9   :  { %v120_v42 = vpop.xlane.xlu0 %119  ;;  %v217_v44 = vadd.f32 %v201_v41, %v589_v37 }
  0xca   :  { %v137_v45 = vadd.f32 %v589_v37, %v120_v42 }
  0xcb   :  { %v344_v46 = vperm.slane %v217_v44, %v293_v1 }
  0xcc   :  { %v294_v47 = vperm.slane %v137_v45, %v293_v1 }
  0xcd   :  { %v345_v51 = vsel %vm295_vm15, %v344_v46, %v343_v49 }
  0xce   :  { %v296_v50 = vsel %vm295_vm15, %v294_v47, %v292_v48  ;;  %347 = vst [vmem:[#allocation3 + $0x1] sm:$0x1] %v345_v51 }
  0xcf   :  { %298 = vst [vmem:[#allocation3] sm:$0x1] %v296_v50 }
  0xd0   :  { %358 = dma.vmem_to_hbm [thread:$0]  %s354_s26, 32, %s356_s29, [#allocation4]  }
  0xd1   :  { %390 = dma.done.wait [#allocation4], 32  }
  0xd2   :  { %391 = vsyncadd [#allocation4], 4294967264 }
  0xd3   :  { %363 = vsyncpa [#allocation4], 1 }

</bundles_post_ra>
